<compile_context>
chip_gen: v7x
topology: tpu7x:2x2x1
jax: 0.10.0
libtpu: 0.0.40
codegen_flags: <defaults>
</compile_context>

<pallas_src>
import functools

import jax
import jax.numpy as jnp
from jax.experimental import pallas as pl
from jax.experimental.pallas import tpu as pltpu

IN_DIM = 10
HID_DIM = 10
OUT_DIM = 5

LANES = 128          # TPU vreg lane width
HID_PAD = LANES      # hidden dim padded to full lane width inside the kernel

# Row layout of the single packed parameter buffer [PARAM_ROWS, LANES].
# Each section starts on an 8-row sublane boundary; everything else is zero.
W1_OFF = 0                    # rows [0, IN_DIM)         : W1 padded to [IN_DIM, HID_PAD]
B1_OFF = 16                   # row  16                  : b1 padded to [1, HID_PAD]
W2_OFF = 24                   # rows [24, 24 + HID_PAD)  : W2 padded to [HID_PAD, LANES]
B2_OFF = W2_OFF + HID_PAD     # row  152                 : b2 padded to [1, LANES]
PARAM_ROWS = 160              # multiple of 8


def toy_mlp_kernel(x_ref, p_ref, o_ref):
    # Load the batch tile and the packed parameters once as values.
    x = x_ref[...]                                   # [tile_b, IN_DIM]
    w1 = p_ref[W1_OFF:W1_OFF + IN_DIM, :]            # [IN_DIM, HID_PAD]
    b1 = p_ref[B1_OFF:B1_OFF + 1, :]                 # [1, HID_PAD]
    w2 = p_ref[W2_OFF:W2_OFF + HID_PAD, :]           # [HID_PAD, LANES]
    b2 = p_ref[B2_OFF:B2_OFF + 1, :]                 # [1, LANES]

    # net1 + ReLU.  Padded hidden columns are exactly zero (zero W1 cols, zero b1,
    # relu(0) = 0), so they contribute nothing to the second matmul.
    h = jnp.dot(x, w1, preferred_element_type=jnp.float32) + b1
    h = jnp.maximum(h, 0.0)
    # net2 computed 128 lanes wide on the MXU (free), but only the OUT_DIM valid
    # columns are stored -> 20 B/row of HBM writeback instead of 512 B/row.
    y = jnp.dot(h, w2, preferred_element_type=jnp.float32) + b2
    o_ref[...] = y[:, :OUT_DIM].astype(o_ref.dtype)


def _round_up(n, m):
    return ((n + m - 1) // m) * m


def pack_params(w1, b1, w2, b2):
    """Pack W1[IN,HID], b1[HID], W2[HID,OUT], b2[OUT] into one zero-padded
    [PARAM_ROWS, 128] buffer (single VMEM-resident DMA instead of four)."""
    p = jnp.zeros((PARAM_ROWS, LANES), jnp.float32)
    p = p.at[W1_OFF:W1_OFF + IN_DIM, :HID_DIM].set(w1.astype(jnp.float32))
    p = p.at[B1_OFF, :HID_DIM].set(jnp.reshape(b1, (HID_DIM,)).astype(jnp.float32))
    p = p.at[W2_OFF:W2_OFF + HID_DIM, :OUT_DIM].set(w2.astype(jnp.float32))
    p = p.at[B2_OFF, :OUT_DIM].set(jnp.reshape(b2, (OUT_DIM,)).astype(jnp.float32))
    return p


@functools.partial(jax.jit, static_argnames=("tile_b",))
def toy_model_forward(x, packed_params, *, tile_b=2048):
    """x: [B, IN_DIM] f32; packed_params: [PARAM_ROWS, 128] from pack_params."""
    B = x.shape[0]
    # Batch tile: multiple of 8 sublanes, no larger than the (rounded-up) batch.
    tile = min(_round_up(tile_b, 8), _round_up(B, 8))
    grid = (pl.cdiv(B, tile),)   # partial last block handled by Pallas masking

    cost = pl.CostEstimate(
        flops=2 * B * (IN_DIM * HID_DIM + HID_DIM * OUT_DIM),
        transcendentals=0,
        bytes_accessed=B * (IN_DIM + OUT_DIM) * 4 + PARAM_ROWS * LANES * 4,
    )

    return pl.pallas_call(
        toy_mlp_kernel,
        out_shape=jax.ShapeDtypeStruct((B, OUT_DIM), jnp.float32),
        grid=grid,
        in_specs=[
            # x: tiled over batch; the pipeline double-buffers the tile DMAs.
            pl.BlockSpec((tile, IN_DIM), lambda i: (i, 0)),
            # packed params: constant block index -> fetched once, stays resident.
            pl.BlockSpec((PARAM_ROWS, LANES), lambda i: (0, 0)),
        ],
        # Narrow output block: only OUT_DIM real columns go back to HBM.
        out_specs=pl.BlockSpec((tile, OUT_DIM), lambda i: (i, 0)),
        compiler_params=pltpu.CompilerParams(
            dimension_semantics=("parallel",),   # shard batch tiles across TCs (v7x)
        ),
        cost_estimate=cost,
    )(x, packed_params)


def init_params(key):
    """Deterministic parameter init mirroring nn.Linear shapes.

    PyTorch stores weight as [out_features, in_features]; we generate in that
    convention and transpose to the [in, out] layout the kernel consumes.
    """
    k1, k2, k3, k4 = jax.random.split(key, 4)
    bound1 = 1.0 / jnp.sqrt(jnp.float32(IN_DIM))
    bound2 = 1.0 / jnp.sqrt(jnp.float32(HID_DIM))
    w1_pt = jax.random.uniform(k1, (HID_DIM, IN_DIM), jnp.float32, -bound1, bound1)
    b1_pt = jax.random.uniform(k2, (HID_DIM,), jnp.float32, -bound1, bound1)
    w2_pt = jax.random.uniform(k3, (OUT_DIM, HID_DIM), jnp.float32, -bound2, bound2)
    b2_pt = jax.random.uniform(k4, (OUT_DIM,), jnp.float32, -bound2, bound2)
    return (
        w1_pt.T,   # [IN, HID]
        b1_pt,     # [HID]
        w2_pt.T,   # [HID, OUT]
        b2_pt,     # [OUT]
    )


def reference_forward(x, w1, b1, w2, b2):
    h = jnp.maximum(x @ w1 + b1, 0.0)
    return h @ w2 + b2


if __name__ == "__main__":
    key = jax.random.PRNGKey(0)
    kx, kp = jax.random.split(key)

    w1, b1, w2, b2 = init_params(kp)
    packed = pack_params(w1, b1, w2, b2)

    # Small single-tile case.
    B = 8
    x = jax.random.normal(kx, (B, IN_DIM), jnp.float32)
    out = jax.block_until_ready(toy_model_forward(x, packed))
    ref = reference_forward(x, w1, b1, w2, b2)
    assert out.shape == (B, OUT_DIM), out.shape
    assert jnp.allclose(out, ref, atol=1e-5, rtol=1e-5), "mismatch vs. JAX reference (B=8)"

    # Multi-tile case with a small tile: exercises the batch grid, the masked
    # partial last block (300 % 128 != 0), and the parallel batch axis.
    B2 = 300
    x2 = jax.random.normal(kx, (B2, IN_DIM), jnp.float32)
    out2 = jax.block_until_ready(toy_model_forward(x2, packed, tile_b=128))
    ref2 = reference_forward(x2, w1, b1, w2, b2)
    assert out2.shape == (B2, OUT_DIM), out2.shape
    assert jnp.allclose(out2, ref2, atol=1e-5, rtol=1e-5), "mismatch vs. JAX reference (B=300)"

    print("KERNEL_OK")
</pallas_src>

<mosaic_0001>
module attributes {stable_mosaic.version = 11 : i64} {
  func.func @toy_mlp_kernel(%arg0: i32, %arg1: memref<8x10xf32, #tpu.memory_space<vmem>>, %arg2: memref<160x128xf32, #tpu.memory_space<vmem>>, %arg3: memref<8x5xf32, #tpu.memory_space<vmem>>) attributes {dimension_semantics = [#tpu.dimension_semantics<parallel>], iteration_bounds = array<i64: 1>, scalar_prefetch = 0 : i64, scratch_operands = 0 : i64, tpu.core_type = #tpu.core_type<tc>, window_params = [{transform_indices = @transform_0, window_bounds = array<i64: 8, 10>}, {pipeline_mode = #tpu.pipeline_mode<synchronous>, transform_indices = @transform_1, window_bounds = array<i64: 160, 128>}, {transform_indices = @transform_2, window_bounds = array<i64: 8, 5>}]} {
    %c0 = arith.constant 0 : index
    %c0_0 = arith.constant 0 : index
    %0 = vector.load %arg1[%c0, %c0_0] : memref<8x10xf32, #tpu.memory_space<vmem>>, vector<8x10xf32>
    %c0_1 = arith.constant 0 : index
    %c0_2 = arith.constant 0 : index
    %1 = vector.load %arg2[%c0_1, %c0_2] : memref<160x128xf32, #tpu.memory_space<vmem>>, vector<10x128xf32>
    %c16 = arith.constant 16 : index
    %c0_3 = arith.constant 0 : index
    %2 = vector.load %arg2[%c16, %c0_3] : memref<160x128xf32, #tpu.memory_space<vmem>>, vector<1x128xf32>
    %c24 = arith.constant 24 : index
    %c0_4 = arith.constant 0 : index
    %3 = vector.load %arg2[%c24, %c0_4] : memref<160x128xf32, #tpu.memory_space<vmem>>, vector<128x128xf32>
    %c152 = arith.constant 152 : index
    %c0_5 = arith.constant 0 : index
    %4 = vector.load %arg2[%c152, %c0_5] : memref<160x128xf32, #tpu.memory_space<vmem>>, vector<1x128xf32>
    %cst = arith.constant dense<0.000000e+00> : vector<8x128xf32>
    %5 = tpu.matmul %0, %1, %cst {dimension_numbers = #tpu.dot_dimension_numbers<[1], [0], [0], [1], [0, 0, 1, 1], [], []>} : vector<8x10xf32>, vector<10x128xf32>, vector<8x128xf32> -> vector<8x128xf32>
    %6 = vector.broadcast %2 : vector<1x128xf32> to vector<8x128xf32>
    %7 = arith.addf %5, %6 : vector<8x128xf32>
    %cst_6 = arith.constant 0.000000e+00 : f32
    %8 = vector.broadcast %cst_6 : f32 to vector<8x128xf32>
    %9 = arith.maximumf %7, %8 : vector<8x128xf32>
    %cst_7 = arith.constant dense<0.000000e+00> : vector<8x128xf32>
    %10 = tpu.matmul %9, %3, %cst_7 {dimension_numbers = #tpu.dot_dimension_numbers<[1], [0], [0], [1], [0, 0, 1, 1], [], []>} : vector<8x128xf32>, vector<128x128xf32>, vector<8x128xf32> -> vector<8x128xf32>
    %11 = vector.broadcast %4 : vector<1x128xf32> to vector<8x128xf32>
    %12 = arith.addf %10, %11 : vector<8x128xf32>
    %13 = vector.extract_strided_slice %12 {offsets = [0, 0], sizes = [8, 5], strides = [1, 1]} : vector<8x128xf32> to vector<8x5xf32>
    %c0_8 = arith.constant 0 : index
    %c0_9 = arith.constant 0 : index
    %14 = vector.load %arg3[%c0_8, %c0_9] : memref<8x5xf32, #tpu.memory_space<vmem>>, vector<8x5xf32>
    tpu.vector_store %arg3[%c0_8, %c0_9], %13 {strides = array<i32>} : memref<8x5xf32, #tpu.memory_space<vmem>>, vector<8x5xf32>,
    return
  }
  func.func @transform_0(%arg0: i32) -> (i32, i32) {
    %c0_i32 = arith.constant 0 : i32
    %c0_i32_0 = arith.constant 0 : i32
    return %arg0, %c0_i32 : i32, i32
  }
  func.func @transform_1(%arg0: i32) -> (i32, i32) {
    %c0_i32 = arith.constant 0 : i32
    %c0_i32_0 = arith.constant 0 : i32
    %c0_i32_1 = arith.constant 0 : i32
    return %c0_i32, %c0_i32_0 : i32, i32
  }
  func.func @transform_2(%arg0: i32) -> (i32, i32) {
    %c0_i32 = arith.constant 0 : i32
    %c0_i32_0 = arith.constant 0 : i32
    return %arg0, %c0_i32 : i32, i32
  }
}

</mosaic_0001>

<bundles_post_ra>
// kernel: toy_model_forward.1
= control target key start
LH: loop header
LB: loop body
LE: loop exit
PB: predicated region body
PF: predicated region fallthrough
CT: control target
= control target key end

     0   :  { %7 = vsyncpa [#allocation3], 0  ;;  %s476_s0 = inlined_call_operand.hbm [shape: f32[8,10], index: 0, kind: input, shape index: {}]   ;;  %s477_s1 = inlined_call_operand.hbm [shape: f32[160,128], index: 1, kind: input, shape index: {}]   ;;  %s478_s2 = inlined_call_operand.hbm [shape: f32[8,5], index: 2, kind: output, shape index: {}]  }
   0x1   :  { %8 = vsyncpa [#allocation6], 0 }
   0x2   :  { %9 = vsyncpa [#allocation4], 0  ;;  %s409_s9 = smov [#allocation2]   ;;  %s410_s11 = smov [#allocation5]  }
   0x3   :  { %s16_s10 = sshll.u32 %s409_s9, 4  ;;  %s25_s12 = sshll.u32 %s410_s11, 4  ;;  %s17_s10 = int_to_ptr.vmem [resolvable:$true] %s16_s10  ;;  %s433_s12 = int_to_ptr.vmem [resolvable:$true] %s25_s12 }
   0x4   :  { %s337_s15 = scalar_lea.hbm %s476_s0, 128 }
   0x5   :  { %p338_p0 = scmp.ne.s32.totalorder %s476_s0, %s337_s15  ;;  %p341_p1 = scmp.lt.u32.totalorder %s337_s15, %s476_s0 }
   0x7   :  { %p343_p2 = pnand %p341_p1, %p338_p0 }
   0x9   :  { %346 = shalt.err (!%p343_p2)
}
   0xa   :  { %s347_s20 = scalar_lea.vmem %s17_s10, 128  ;;  %p352_p4 = scmp.lt.s32.totalorder %s17_s10, %s17_s10 }
   0xb   :  { %p348_p3 = scmp.ne.s32.totalorder %s17_s10, %s347_s20  ;;  %p353_p5 = scmp.lt.s32.totalorder %s347_s20, %s347_s20 }
   0xd   :  { %p354_p6 = por %p353_p5, %p352_p4 }
   0xf   :  { %p355_p7 = pnand %p354_p6, %p348_p3 }
  0x11   :  { %358 = shalt.err (!%p355_p7)
}
  0x12   :  { %19 = dma.hbm_to_vmem [thread:$0]  %s476_s0, 128, %s17_s10, [#allocation3]  }
  0x13   :  { %s359_s25 = scalar_lea.hbm %s477_s1, 2560 }
  0x14   :  { %p360_p8 = scmp.ne.s32.totalorder %s477_s1, %s359_s25  ;;  %p363_p9 = scmp.lt.u32.totalorder %s359_s25, %s477_s1 }
  0x16   :  { %p365_p10 = pnand %p363_p9, %p360_p8 }
  0x18   :  { %368 = shalt.err (!%p365_p10)
}
  0x19   :  { %s369_s30 = scalar_lea.vmem %s433_s12, 2560  ;;  %p374_p12 = scmp.lt.s32.totalorder %s433_s12, %s433_s12 }
  0x1a   :  { %p370_p11 = scmp.ne.s32.totalorder %s433_s12, %s369_s30  ;;  %p375_p13 = scmp.lt.s32.totalorder %s369_s30, %s369_s30 }
  0x1c   :  { %p376_p0 = por %p375_p13, %p374_p12 }
  0x1e   :  { %p377_p1 = pnand %p376_p0, %p370_p11 }
  0x20   :  { %380 = shalt.err (!%p377_p1)
}
  0x21   :  { %s411_s0 = smov 128   ;;  %s412_s3 = smov 8  }
  0x22   :  { %31 = dma.hbm_to_vmem [thread:$0]  %s477_s1, 2560, %s433_s12, [#allocation6], %s411_s0, %s411_s0, %s412_s3  }
  0x23   :  { %403 = dma.done.wait [#allocation3], 128  }
  0x24   :  { %404 = vsyncadd [#allocation3], 4294967168 }
  0x25   :  { %405 = dma.done.wait [#allocation6], 2560  }
  0x26   :  { %406 = vsyncadd [#allocation6], 4294964736  ;;  %v413_v0 = vmov 0.0|0.0   ;;  %vm414_vm0 = vmmov 0   ;;  %v415_v1 = vmov 0.0   ;;  %vm67_vm1 = vcmask 1041408  }
  0x27   :  { %300 = vmatprep.subr.bf16.mxu0 %v413_v0  ;;  %304 = vmatprep.subr.bf16.mxu1 %v413_v0  ;;  %v39_v2 = vld [vmem:[#allocation5] sm:$0xff]  ;;  %v40_v3 = vld [vmem:[#allocation5 + $0x8] sm:$0x3]  ;;  %vm416_vm2 = vmmov 1   ;;  %v42_v5 = vld [vmem:[#allocation5 + $0x18] sm:$0xff]  ;;  %vm63_vm4 = vcmask 80896  }
  0x28   :  { %262 = vmatprep.mubr.msk.f32.mxu0 %vm414_vm0, %v415_v1  ;;  %297 = vmatprep.mubr.msk.f32.mxu1 %vm414_vm0, %v415_v1  ;;  %vm302_vm3 = vmpackc.low %vm67_vm1, %vm416_vm2  ;;  %v301_v4 = vpack.c.bf16 %v40_v3, %v39_v2  ;;  %v43_v6 = vld [vmem:[#allocation5 + $0x20] sm:$0xff]  ;;  %v44_v7 = vld [vmem:[#allocation5 + $0x28] sm:$0xff]  ;;  %s417_s1 = smov [#allocation7]   ;;  %vm216_vm5 = vcmask 39936  }
  0x29   :  { %v305_v8 = vpack.c.bf16 %v43_v6, %v42_v5  ;;  %v45_v9 = vld [vmem:[#allocation5 + $0x30] sm:$0xff]  ;;  %v38_v10 = vld [vmem:[#allocation2] sm:$0xff]  ;;  %v47_v13 = vld [vmem:[#allocation5 + $0x40] sm:$0xff]  ;;  %s224_s6 = sshll.u32 %s417_s1, 4  ;;  %s225_s6 = int_to_ptr.vmem [resolvable:$true] %s224_s6 }
  0x2a   :  { %303 = vmatpush3.bf16.msk.msra.mxu0 %vm302_vm3, %v301_v4  ;;  %v308_v11 = vpack.c.bf16 %v45_v9, %v44_v7  ;;  %v46_v12 = vld [vmem:[#allocation5 + $0x38] sm:$0xff]  ;;  %v48_v15 = vld [vmem:[#allocation5 + $0x48] sm:$0xff]  ;;  %v49_v16 = vld [vmem:[#allocation5 + $0x50] sm:$0xff]  ;;  %s381_s7 = scalar_lea.vmem %s225_s6, 128  ;;  %p386_p3 = scmp.lt.s32.totalorder %s225_s6, %s225_s6 }
  0x2b   :  { %306 = vmatpush3.bf16.msra.mxu1 %v305_v8  ;;  %v311_v14 = vpack.c.bf16 %v47_v13, %v46_v12  ;;  %v314_v17 = vpack.c.bf16 %v49_v16, %v48_v15  ;;  %v50_v18 = vld [vmem:[#allocation5 + $0x58] sm:$0xff]  ;;  %v51_v19 = vld [vmem:[#allocation5 + $0x60] sm:$0xff]  ;;  %v52_v21 = vld [vmem:[#allocation5 + $0x68] sm:$0xff]  ;;  %p382_p2 = scmp.ne.s32.totalorder %s225_s6, %s381_s7  ;;  %p387_p4 = scmp.lt.s32.totalorder %s381_s7, %s381_s7 }
  0x2c   :  { %307 = vmatprep.subr.bf16.mxu1 %v413_v0  ;;  %v317_v20 = vpack.c.bf16 %v51_v19, %v50_v18  ;;  %v53_v22 = vld [vmem:[#allocation5 + $0x70] sm:$0xff]  ;;  %v54_v24 = vld [vmem:[#allocation5 + $0x78] sm:$0xff]  ;;  %v55_v25 = vld [vmem:[#allocation5 + $0x80] sm:$0xff] }
  0x2d   :  { %263 = vmatmul.mubr.msk.f32.vlgmr.msra.gmra.mrb[0].mxu0 %vm63_vm4, %v38_v10  ;;  %v320_v23 = vpack.c.bf16 %v53_v22, %v52_v21  ;;  %v323_v26 = vpack.c.bf16 %v55_v25, %v54_v24  ;;  %v56_v27 = vld [vmem:[#allocation5 + $0x88] sm:$0xff]  ;;  %v57_v28 = vld [vmem:[#allocation5 + $0x90] sm:$0xff]  ;;  %v237_v35 = vld [vmem:[#allocation5 + $0x98] ss:$0 sm:$0xff]  ;;  %p388_p5 = por %p387_p4, %p386_p3 }
  0x2e   :  { %v326_v29 = vpack.c.bf16 %v57_v28, %v56_v27  ;;  %v234_v30 = vld [vmem:[#allocation5 + $0x10] ss:$0 sm:$0xff] }
  0x2f   :  { %309 = vmatpush3.bf16.msra.mxu1 %v308_v11  ;;  %p389_p6 = pnand %p388_p5, %p382_p2 }
  0x30   :  { %310 = vmatprep.subr.bf16.mxu1 %v413_v0 }
  0x33   :  { %312 = vmatpush3.bf16.msra.mxu1 %v311_v14 }
  0x34   :  { %313 = vmatprep.subr.bf16.mxu1 %v413_v0 }
  0x37   :  { %315 = vmatpush3.bf16.msra.mxu1 %v314_v17 }
  0x38   :  { %316 = vmatprep.subr.bf16.mxu1 %v413_v0 }
  0x3b   :  { %318 = vmatpush3.bf16.msra.mxu1 %v317_v20 }
  0x3c   :  { %319 = vmatprep.subr.bf16.mxu1 %v413_v0 }
  0x3f   :  { %321 = vmatpush3.bf16.msra.mxu1 %v320_v23 }
  0x40   :  { %322 = vmatprep.subr.bf16.mxu1 %v413_v0 }
  0x43   :  { %324 = vmatpush3.bf16.msra.mxu1 %v323_v26 }
  0x44   :  { %325 = vmatprep.subr.bf16.mxu1 %v413_v0 }
  0x47   :  { %327 = vmatpush3.bf16.msra.mxu1 %v326_v29 }
 0x100   :  { %v137_v31 = vpop.f32.mrb[0].mxu0 }
 0x101   :  { %v138_v32 = vadd.f32 %v234_v30, %v137_v31  ;;  %v264_v33 = vpop.f32.mrb[1].mxu0 }
 0x103   :  { %v141_v34 = vmax.f32 %v138_v32, 0.0 }
 0x105   :  { %298 = vmatmul.mubr.f32.vlgmr.msra.gmra.mrb[0].mxu1 %v141_v34 }
 0x1d8   :  { %v212_v36 = vpop.f32.mrb[0].mxu1 }
 0x1d9   :  { %v213_v37 = vadd.f32 %v237_v35, %v212_v36  ;;  %v299_v38 = vpop.f32.mrb[1].mxu1 }
 0x1db   :  { %217 = vst.msk [vmem:[#allocation7] sm:$0xff] %vm216_vm5, %v213_v37 }
 0x1dc   :  { %392 = shalt.err (!%p389_p6)
}
 0x1dd   :  { %s393_s10 = scalar_lea.hbm %s478_s2, 128 }
 0x1de   :  { %p394_p7 = scmp.ne.s32.totalorder %s478_s2, %s393_s10  ;;  %p397_p8 = scmp.lt.u32.totalorder %s393_s10, %s478_s2 }
 0x1e0   :  { %p399_p9 = pnand %p397_p8, %p394_p7 }
 0x1e2   :  { %402 = shalt.err (!%p399_p9)
}
 0x1e3   :  { %227 = dma.vmem_to_hbm [thread:$0]  %s225_s6, 128, %s478_s2, [#allocation4]  }
 0x1e4   :  { %407 = dma.done.wait [#allocation4], 128  }
 0x1e5   :  { %408 = vsyncadd [#allocation4], 4294967168 }
 0x1e6   :  { %231 = vsyncpa [#allocation3], 1 }
 0x1e7   :  { %232 = vsyncpa [#allocation6], 1 }
 0x1e8   :  { %233 = vsyncpa [#allocation4], 1 }

</bundles_post_ra>
